<compile_context>
chip_gen: v6e
topology: v6e:2x2x1
jax: 0.10.0
libtpu: 0.0.40
codegen_flags: <defaults>
</compile_context>

<pallas_src>
import jax
import jax.numpy as jnp
from jax import lax
from jax.experimental import pallas as pl
from jax.experimental.pallas import tpu as pltpu


def _round_up(x, m):
    return ((x + m - 1) // m) * m


def make_lpdecoder_kernel(num_layers):
    """Builds the kernel body for a `num_layers`-deep LPDecoder."""

    def kernel(xi_ref, xj_ref, *refs):
        o_ref = refs[-1]
        wb = refs[:-1]          # w0, b0, w1, b1, ..., wL, bL

        # Elementwise product of the node embeddings in f32 (VPU), then bf16
        # for the MXU.  (TM, C)
        prod = (xi_ref[...] * xj_ref[...]).astype(jnp.bfloat16)

        # First layer as W @ prod^T via dot_general contracting the minor dim
        # of both operands (the standard q@k^T pattern) -> activation is
        # already transposed: (H_out, TM), lane-dense along the row tile.
        w, b = wb[0][...], wb[1][...]
        x = lax.dot_general(w, prod, (((1,), (1,)), ((), ())),
                            preferred_element_type=jnp.float32) + b

        if num_layers > 1:
            x = jnp.maximum(x, 0.0).astype(jnp.bfloat16)
            # Middle hidden layers (dropout is identity in eval mode).
            for l in range(1, num_layers - 1):
                w, b = wb[2 * l][...], wb[2 * l + 1][...]
                x = jnp.dot(w, x, preferred_element_type=jnp.float32) + b
                x = jnp.maximum(x, 0.0).astype(jnp.bfloat16)
            # Output layer (no ReLU).
            w, b = wb[-2][...], wb[-1][...]
            x = jnp.dot(w, x, preferred_element_type=jnp.float32) + b

        o_ref[...] = jax.nn.sigmoid(x)      # (out_dim, TM), lane-dense

    return kernel


def lpdecoder_forward(x_i, x_j, params, *, block_rows=2048):
    """params = [(W, b), ...] in PyTorch layout: W (out, in), b (out,).

    Returns sigmoid(MLP(x_i * x_j)) of shape (N, out_channels), f32.
    """
    N, C = x_i.shape
    num_layers = len(params)
    out_dim = params[-1][0].shape[0]

    # Row tile: multiple of 128 (lane-dense transposed activations / output).
    # Production sizing: 2048-8192 rows keeps per-step overhead negligible
    # while using only ~TM*C*4B per pipeline buffer (~1 MiB at TM=8192, C=32).
    ALIGN = 128
    tm = _round_up(min(block_rows, _round_up(N, ALIGN)), ALIGN)
    n_pad = _round_up(N, tm)
    n_blocks = n_pad // tm

    pad = n_pad - N
    if pad:
        x_i = jnp.pad(x_i, ((0, pad), (0, 0)))
        x_j = jnp.pad(x_j, ((0, pad), (0, 0)))

    # Stream f32 directly (no wrapper-side bf16 conversion pass over HBM).
    flat_args = [x_i.astype(jnp.float32), x_j.astype(jnp.float32)]
    x_spec = pl.BlockSpec((tm, C), lambda i: (i, 0))
    in_specs = [x_spec, x_spec]

    def resident(arr):
        # Full-array block + constant index_map: DMA'd into VMEM once and kept
        # resident across the whole grid (never re-fetched per tile).
        return pl.BlockSpec(arr.shape, lambda i: (0, 0))

    for w, b in params:
        w_arg = jnp.asarray(w, jnp.bfloat16)                 # (out, in), MXU
        b_arg = jnp.asarray(b, jnp.float32).reshape(-1, 1)   # (out, 1), f32
        flat_args += [w_arg, b_arg]
        in_specs += [resident(w_arg), resident(b_arg)]

    # Transposed, lane-dense output: (out_dim, n_pad), block (out_dim, tm).
    out_spec = pl.BlockSpec((out_dim, tm), lambda i: (0, i))

    # Advisory cost estimate so XLA schedules around the call sensibly.
    flops = n_pad * C  # elementwise product
    for w, _ in params:
        flops += n_pad * (2 * w.shape[0] * w.shape[1] + w.shape[0])
    weight_bytes = sum(int(a.size) * a.dtype.itemsize for a in flat_args[2:])
    bytes_accessed = (2 * n_pad * C * 4          # f32 x_i, x_j
                      + n_pad * out_dim * 4      # f32 output
                      + weight_bytes)
    cost = pl.CostEstimate(flops=int(flops),
                           transcendentals=int(n_pad * out_dim),
                           bytes_accessed=int(bytes_accessed))

    out_t = pl.pallas_call(
        make_lpdecoder_kernel(num_layers),
        grid=(n_blocks,),
        in_specs=in_specs,
        out_specs=out_spec,
        out_shape=jax.ShapeDtypeStruct((out_dim, n_pad), jnp.float32),
        compiler_params=pltpu.CompilerParams(
            dimension_semantics=("parallel",),   # shard N across v7x's 2 TCs
            vmem_limit_bytes=32 * 1024 * 1024,   # above v5e's 16 MiB scoped default
        ),
        cost_estimate=cost,
    )(*flat_args)

    # (out_dim, n_pad) -> (N, out_dim); for out_dim == 1 this is just a reshape.
    return out_t[:, :N].T


def init_linear(key, fan_in, fan_out):
    """Deterministic PyTorch-style Linear init: U(-1/sqrt(fan_in), +1/sqrt(fan_in)).

    Returns W in native PyTorch (out, in) layout and b of shape (out,).
    """
    kw, kb = jax.random.split(key)
    bound = 1.0 / jnp.sqrt(fan_in)
    w = jax.random.uniform(kw, (fan_out, fan_in), jnp.float32, -bound, bound)
    b = jax.random.uniform(kb, (fan_out,), jnp.float32, -bound, bound)
    return w, b


def reference_forward(x_i, x_j, params):
    x = x_i * x_j
    for w, b in params[:-1]:
        x = jnp.maximum(x @ w.T + b, 0.0)
    w, b = params[-1]
    return jax.nn.sigmoid(x @ w.T + b)


if __name__ == "__main__":
    # LPDecoder(in_channels=32, hidden_channels=32, out_channels=1,
    #           num_layers=3, dropout=0.5) -- eval mode (dropout = identity).
    in_channels, hidden_channels, out_channels = 32, 32, 1
    num_layers = 3
    N = 1000          # non-multiple of tile -> exercises padding + multi-step grid
    block_rows = 256  # small for the demo; use 2048-8192 in production

    key = jax.random.PRNGKey(0)
    k_xi, k_xj, k0, k1, k2 = jax.random.split(key, 5)

    x_i = jax.random.normal(k_xi, (N, in_channels), jnp.float32)
    x_j = jax.random.normal(k_xj, (N, in_channels), jnp.float32)

    dims = [in_channels] + [hidden_channels] * (num_layers - 1) + [out_channels]
    params = [
        init_linear(k0, dims[0], dims[1]),
        init_linear(k1, dims[1], dims[2]),
        init_linear(k2, dims[2], dims[3]),
    ]

    out = lpdecoder_forward(x_i, x_j, params, block_rows=block_rows)
    out = jax.block_until_ready(out)

    ref = reference_forward(x_i, x_j, params)  # f32 reference
    assert out.shape == (N, out_channels)
    # bf16 matmul operands inside the kernel -> relaxed tolerance vs. f32 ref.
    err = float(jnp.max(jnp.abs(out - ref)))
    assert jnp.allclose(out, ref, atol=3e-2, rtol=3e-2), f"max abs err {err}"

    # TODO(synk): F.dropout between hidden layers is a no-op in eval mode and is
    # not implemented (training-mode stochastic masking omitted).
    print("KERNEL_OK")
</pallas_src>

<mosaic_0001>
module attributes {stable_mosaic.version = 11 : i64} {
  func.func @kernel(%arg0: i32, %arg1: memref<256x32xf32, #tpu.memory_space<vmem>>, %arg2: memref<256x32xf32, #tpu.memory_space<vmem>>, %arg3: memref<32x32xbf16, #tpu.memory_space<vmem>>, %arg4: memref<32x1xf32, #tpu.memory_space<vmem>>, %arg5: memref<32x32xbf16, #tpu.memory_space<vmem>>, %arg6: memref<32x1xf32, #tpu.memory_space<vmem>>, %arg7: memref<1x32xbf16, #tpu.memory_space<vmem>>, %arg8: memref<1x1xf32, #tpu.memory_space<vmem>>, %arg9: memref<1x256xf32, #tpu.memory_space<vmem>>) attributes {dimension_semantics = [#tpu.dimension_semantics<parallel>], iteration_bounds = array<i64: 4>, scalar_prefetch = 0 : i64, scratch_operands = 0 : i64, tpu.core_type = #tpu.core_type<tc>, window_params = [{transform_indices = @transform_0, window_bounds = array<i64: 256, 32>}, {transform_indices = @transform_1, window_bounds = array<i64: 256, 32>}, {pipeline_mode = #tpu.pipeline_mode<synchronous>, transform_indices = @transform_2, window_bounds = array<i64: 32, 32>}, {pipeline_mode = #tpu.pipeline_mode<synchronous>, transform_indices = @transform_3, window_bounds = array<i64: 32, 1>}, {pipeline_mode = #tpu.pipeline_mode<synchronous>, transform_indices = @transform_4, window_bounds = array<i64: 32, 32>}, {pipeline_mode = #tpu.pipeline_mode<synchronous>, transform_indices = @transform_5, window_bounds = array<i64: 32, 1>}, {pipeline_mode = #tpu.pipeline_mode<synchronous>, transform_indices = @transform_6, window_bounds = array<i64: 1, 32>}, {pipeline_mode = #tpu.pipeline_mode<synchronous>, transform_indices = @transform_7, window_bounds = array<i64: 1, 1>}, {transform_indices = @transform_8, window_bounds = array<i64: 1, 256>}]} {
    %c0 = arith.constant 0 : index
    %c0_0 = arith.constant 0 : index
    %0 = vector.load %arg1[%c0, %c0_0] : memref<256x32xf32, #tpu.memory_space<vmem>>, vector<256x32xf32>
    %c0_1 = arith.constant 0 : index
    %c0_2 = arith.constant 0 : index
    %1 = vector.load %arg2[%c0_1, %c0_2] : memref<256x32xf32, #tpu.memory_space<vmem>>, vector<256x32xf32>
    %2 = arith.mulf %0, %1 : vector<256x32xf32>
    %3 = arith.truncf %2 : vector<256x32xf32> to vector<256x32xbf16>
    %c0_3 = arith.constant 0 : index
    %c0_4 = arith.constant 0 : index
    %4 = vector.load %arg3[%c0_3, %c0_4] : memref<32x32xbf16, #tpu.memory_space<vmem>>, vector<32x32xbf16>
    %c0_5 = arith.constant 0 : index
    %c0_6 = arith.constant 0 : index
    %5 = vector.load %arg4[%c0_5, %c0_6] : memref<32x1xf32, #tpu.memory_space<vmem>>, vector<32x1xf32>
    %cst = arith.constant dense<0.000000e+00> : vector<32x256xf32>
    %6 = tpu.matmul %4, %3, %cst {dimension_numbers = #tpu.dot_dimension_numbers<[1], [1], [0], [0], [0, 0, 1, 0], [], []>} : vector<32x32xbf16>, vector<256x32xbf16>, vector<32x256xf32> -> vector<32x256xf32>
    %7 = vector.broadcast %5 : vector<32x1xf32> to vector<32x256xf32>
    %8 = arith.addf %6, %7 : vector<32x256xf32>
    %cst_7 = arith.constant 0.000000e+00 : f32
    %9 = vector.broadcast %cst_7 : f32 to vector<32x256xf32>
    %10 = arith.maximumf %8, %9 : vector<32x256xf32>
    %11 = arith.truncf %10 : vector<32x256xf32> to vector<32x256xbf16>
    %c0_8 = arith.constant 0 : index
    %c0_9 = arith.constant 0 : index
    %12 = vector.load %arg5[%c0_8, %c0_9] : memref<32x32xbf16, #tpu.memory_space<vmem>>, vector<32x32xbf16>
    %c0_10 = arith.constant 0 : index
    %c0_11 = arith.constant 0 : index
    %13 = vector.load %arg6[%c0_10, %c0_11] : memref<32x1xf32, #tpu.memory_space<vmem>>, vector<32x1xf32>
    %cst_12 = arith.constant dense<0.000000e+00> : vector<32x256xf32>
    %14 = tpu.matmul %12, %11, %cst_12 {dimension_numbers = #tpu.dot_dimension_numbers<[1], [0], [0], [1], [0, 0, 1, 1], [], []>} : vector<32x32xbf16>, vector<32x256xbf16>, vector<32x256xf32> -> vector<32x256xf32>
    %15 = vector.broadcast %13 : vector<32x1xf32> to vector<32x256xf32>
    %16 = arith.addf %14, %15 : vector<32x256xf32>
    %cst_13 = arith.constant 0.000000e+00 : f32
    %17 = vector.broadcast %cst_13 : f32 to vector<32x256xf32>
    %18 = arith.maximumf %16, %17 : vector<32x256xf32>
    %19 = arith.truncf %18 : vector<32x256xf32> to vector<32x256xbf16>
    %c0_14 = arith.constant 0 : index
    %c0_15 = arith.constant 0 : index
    %20 = vector.load %arg7[%c0_14, %c0_15] : memref<1x32xbf16, #tpu.memory_space<vmem>>, vector<1x32xbf16>
    %c0_16 = arith.constant 0 : index
    %c0_17 = arith.constant 0 : index
    %21 = vector.load %arg8[%c0_16, %c0_17] : memref<1x1xf32, #tpu.memory_space<vmem>>, vector<1x1xf32>
    %cst_18 = arith.constant dense<0.000000e+00> : vector<1x256xf32>
    %22 = tpu.matmul %20, %19, %cst_18 {dimension_numbers = #tpu.dot_dimension_numbers<[1], [0], [0], [1], [0, 0, 1, 1], [], []>} : vector<1x32xbf16>, vector<32x256xbf16>, vector<1x256xf32> -> vector<1x256xf32>
    %23 = vector.broadcast %21 : vector<1x1xf32> to vector<1x256xf32>
    %24 = arith.addf %22, %23 : vector<1x256xf32>
    %25 = arith.negf %24 : vector<1x256xf32>
    %26 = math.exp %25 : vector<1x256xf32>
    %cst_19 = arith.constant 1.000000e+00 : f32
    %27 = vector.broadcast %cst_19 : f32 to vector<1x256xf32>
    %28 = arith.addf %27, %26 : vector<1x256xf32>
    %29 = arith.divf %27, %28 : vector<1x256xf32>
    %c0_20 = arith.constant 0 : index
    %c0_21 = arith.constant 0 : index
    %30 = vector.load %arg9[%c0_20, %c0_21] : memref<1x256xf32, #tpu.memory_space<vmem>>, vector<1x256xf32>
    tpu.vector_store %arg9[%c0_20, %c0_21], %29 {strides = array<i32>} : memref<1x256xf32, #tpu.memory_space<vmem>>, vector<1x256xf32>,
    return
  }
  func.func @transform_0(%arg0: i32) -> (i32, i32) {
    %c0_i32 = arith.constant 0 : i32
    %c0_i32_0 = arith.constant 0 : i32
    return %arg0, %c0_i32 : i32, i32
  }
  func.func @transform_1(%arg0: i32) -> (i32, i32) {
    %c0_i32 = arith.constant 0 : i32
    %c0_i32_0 = arith.constant 0 : i32
    return %arg0, %c0_i32 : i32, i32
  }
  func.func @transform_2(%arg0: i32) -> (i32, i32) {
    %c0_i32 = arith.constant 0 : i32
    %c0_i32_0 = arith.constant 0 : i32
    %c0_i32_1 = arith.constant 0 : i32
    return %c0_i32, %c0_i32_0 : i32, i32
  }
  func.func @transform_3(%arg0: i32) -> (i32, i32) {
    %c0_i32 = arith.constant 0 : i32
    %c0_i32_0 = arith.constant 0 : i32
    %c0_i32_1 = arith.constant 0 : i32
    return %c0_i32, %c0_i32_0 : i32, i32
  }
  func.func @transform_4(%arg0: i32) -> (i32, i32) {
    %c0_i32 = arith.constant 0 : i32
    %c0_i32_0 = arith.constant 0 : i32
    %c0_i32_1 = arith.constant 0 : i32
    return %c0_i32, %c0_i32_0 : i32, i32
  }
  func.func @transform_5(%arg0: i32) -> (i32, i32) {
    %c0_i32 = arith.constant 0 : i32
    %c0_i32_0 = arith.constant 0 : i32
    %c0_i32_1 = arith.constant 0 : i32
    return %c0_i32, %c0_i32_0 : i32, i32
  }
  func.func @transform_6(%arg0: i32) -> (i32, i32) {
    %c0_i32 = arith.constant 0 : i32
    %c0_i32_0 = arith.constant 0 : i32
    %c0_i32_1 = arith.constant 0 : i32
    return %c0_i32, %c0_i32_0 : i32, i32
  }
  func.func @transform_7(%arg0: i32) -> (i32, i32) {
    %c0_i32 = arith.constant 0 : i32
    %c0_i32_0 = arith.constant 0 : i32
    %c0_i32_1 = arith.constant 0 : i32
    return %c0_i32, %c0_i32_0 : i32, i32
  }
  func.func @transform_8(%arg0: i32) -> (i32, i32) {
    %c0_i32 = arith.constant 0 : i32
    %c0_i32_0 = arith.constant 0 : i32
    return %c0_i32, %arg0 : i32, i32
  }
}

</mosaic_0001>

<bundles_post_ra>
// kernel: tpu_custom_call.1
= control target key start
LH: loop header
LB: loop body
LE: loop exit
PB: predicated region body
PF: predicated region fallthrough
CT: control target
= control target key end

     0   :  { %s1337_s0 = inlined_call_operand.vmem [shape: f32[1024,32], index: 0, kind: input, shape index: {}]   ;;  %s1338_s1 = inlined_call_operand.vmem [shape: f32[1024,32], index: 1, kind: input, shape index: {}]   ;;  %s1339_s2 = inlined_call_operand.vmem [shape: bf16[32,32], index: 2, kind: input, shape index: {}]   ;;  %s1340_s3 = inlined_call_operand.vmem [shape: f32[32,1], index: 3, kind: input, shape index: {}]   ;;  %s1341_s4 = inlined_call_operand.vmem [shape: bf16[32,32], index: 4, kind: input, shape index: {}]   ;;  %s1342_s5 = inlined_call_operand.vmem [shape: f32[32,1], index: 5, kind: input, shape index: {}]   ;;  %s1343_s6 = inlined_call_operand.vmem [shape: bf16[1,32], index: 6, kind: input, shape index: {}]   ;;  %s1344_s7 = inlined_call_operand.<no memory space> [shape: f32[1,1], index: 7, kind: input, shape index: {}]   ;;  %s1345_s8 = inlined_call_operand.hbm [shape: f32[1,1024], index: 8, kind: output, shape index: {}]  }
   0x1   :  { %v13_v0 = vstv %s1344_s7 }
   0x2   :  { %14 = vst [vmem:[#allocation2] sm:$0x1] %v13_v0 }
   0x3   :  { %15 = vsyncpa [#allocation4], 0 }
   0x4   :  { %17 = vsyncpa [#allocation4 + $0x1], 0  ;;  %s1109_s29 = smov 0   ;;  %s1111_s30 = smov 0  }
   0x5   :  { %s1113_s9 = smov 0   ;;  %s1115_s10 = smov 0  }
   0x6 LB: > { %s886_s7 = sadd.s32 4294967295, %s1056_s10   ;;  %s887_s11 = sadd.s32 4294967294, %s1056_s10   ;;  %s1056_s10 = sphi %s1115_s10, %s1351_s10   ;;  %s1052_s9 = sphi %s1113_s9, %s1350_s9   ;;  %s1048_s30 = sphi %s1111_s30, %s1349_s30   ;;  %s1044_s29 = sphi %s1109_s29, %s1348_s29  }
   0x7   : > { %s1132_s12 = sadd.s32 1, %s1056_s10   ;;  %s208_s13 = sadd.s32 1, %s1052_s9 }
   0x8   : > { %s205_s14 = ssub.s32 %s1056_s10, %s1132_s12  ;;  %p218_p0 = scmp.ne.s32.totalorder %s1052_s9, %s1048_s30 }
   0x9   : > { %p206_p1 = scmp.eq.s32.totalorder %s205_s14, 0  ;;  %p219_p2 = scmp.eq.s32.totalorder %s886_s7, 3 }
   0xa   : > { %p224_p3 = scmp.ne.s32.totalorder %s1048_s30, %s1044_s29  ;;  %p225_p4 = scmp.eq.s32.totalorder %s887_s11, 3 }
   0xb   : > { %s1142_s15 = scalar_select %p206_p1, %s1052_s9, %s208_s13  }
   0xc   : > { %p1144_p5 = por %p219_p2, %p218_p0  ;;  %p1148_p6 = por %p225_p4, %p224_p3 }
   0xd   : > { %p890_p7 = scmp.ge.s32.totalorder %s1056_s10, 1  ;;  %p279_p8 = scmp.lt.s32.totalorder %s1056_s10, 5 }
   0xf   : > { %p280_p9 = pnand %p890_p7, %p279_p8 }
  0x10   : > { %s1154_s18 = sshll.u32 (!%p280_p9), %s886_s7, 5  ;;  %s315_s25 = sand.u32 (!%p280_p9), 1, %s1048_s30  }
  0x11   : > { %283 = sbr.rel (%p280_p9) target bundleno = 788 (0x314), region = 52  ;;  %p319_p10 = scmp.lt.s32.totalorder (!%p280_p9), %s1154_s18, 127 }
  0x12   : > { %s814_s14 = scalar_lea.hbm (!%p280_p9), %s1345_s8, %s1154_s18  ;;  %s802_s19 = scalar_lea.sflag (!%p280_p9), [#allocation4], %s315_s25 }
  0x16   : > { %v1160_v1 = vld [vmem:[%s1339_s2] sm:$0xff]   ;;  %vm482_vm0 = vcmask 261120   ;;  %v450_v2 = vld [vmem:[%s1340_s3 + $0x10] sm:$0xff]  ;;  %s320_s23 = scalar_select %p319_p10, %s1154_s18, 127  ;;  %v1058_v3 = vmov 0   ;;  %v451_v5 = vld [vmem:[%s1340_s3 + $0x18] sm:$0xff] }
  0x17   : > { %929 = vmatprep.mubr.msk.bf16.mxu0 %vm482_vm0, %v1160_v1  ;;  %982 = vset.pattern.permute.xlu0 %v1058_v3  ;;  %v448_v4 = vld [vmem:[%s1340_s3] sm:$0xff]  ;;  %v449_v6 = vld [vmem:[%s1340_s3 + $0x8] sm:$0xff]  ;;  %v608_v10 = vld [vmem:[%s1342_s5 + $0x10] sm:$0xff] }
  0x18   : > { %464 = vperm.xlu0 %982, %v450_v2   ;;  %983 = vset.pattern.permute.xlu1 %v1058_v3  ;;  %s893_s26 = sshll.u32 %s320_s23, 3  ;;  %v609_v15 = vld [vmem:[%s1342_s5 + $0x18] sm:$0xff]  ;;  %v606_v35 = vld [vmem:[%s1342_s5] sm:$0xff]  ;;  %v607_v42 = vld [vmem:[%s1342_s5 + $0x8] sm:$0xff] }
  0x19   : > { %454 = vperm.xlu1 %983, %v448_v4   ;;  %678 = vmatprep.mubr.bf16.mxu1 %v1058_v3  ;;  %s1180_s13 = scalar_lea.vmem %s1337_s0, %s893_s26  ;;  %s1185_s20 = scalar_lea.vmem %s1338_s1, %s893_s26  ;;  %v712_v47 = vld [vmem:[#allocation2] sm:$0x1] }
  0x1a   : > { %v362_v7 = vld [vmem:[%s1180_s13 + $0xf0] sm:$0xff]  ;;  %v363_v8 = vld [vmem:[%s1180_s13 + $0xf8] sm:$0xff]  ;;  %v360_v19 = vld [vmem:[%s1180_s13 + $0xe0] sm:$0xff]  ;;  %s891_s26 = sshll.u32 %s315_s25, 1 }
  0x1b   : > { %v394_v9 = vld [vmem:[%s1185_s20 + $0xf0] sm:$0xff]  ;;  %v395_v11 = vld [vmem:[%s1185_s20 + $0xf8] sm:$0xff]  ;;  %v361_v22 = vld [vmem:[%s1180_s13 + $0xe8] sm:$0xff]  ;;  %s317_s27 = scalar_lea.vmem [#allocation3], %s891_s26 }
  0x1c   : > { %v426_v12 = vmul.f32 %v394_v9, %v362_v7  ;;  %v346_v13 = vld [vmem:[%s1180_s13 + $0x70] sm:$0xff]  ;;  %v347_v14 = vld [vmem:[%s1180_s13 + $0x78] sm:$0xff]  ;;  %469 = vperm.xlu0 %982, %v451_v5   ;;  %v427_v16 = vmul.f32 %v395_v11, %v363_v8  ;;  %v392_v23 = vld [vmem:[%s1185_s20 + $0xe0] sm:$0xff]  ;;  %s816_s28 = sshll.u32 %s317_s27, 4  ;;  %s817_s28 = int_to_ptr.vmem [resolvable:$true] %s816_s28 }
  0x1d   : > { %v378_v17 = vld [vmem:[%s1185_s20 + $0x70] sm:$0xff]  ;;  %v379_v18 = vld [vmem:[%s1185_s20 + $0x78] sm:$0xff]  ;;  %459 = vperm.xlu1 %983, %v449_v6   ;;  %v393_v24 = vld [vmem:[%s1185_s20 + $0xe8] sm:$0xff]  ;;  %v424_v26 = vmul.f32 %v392_v23, %v360_v19 }
  0x1e   : > { %v410_v20 = vmul.f32 %v378_v17, %v346_v13  ;;  %v411_v21 = vmul.f32 %v379_v18, %v347_v14  ;;  %v443_v25 = vpack.c.bf16 %v427_v16, %v426_v12  ;;  %v425_v27 = vmul.f32 %v393_v24, %v361_v22  ;;  %v344_v28 = vld [vmem:[%s1180_s13 + $0x60] sm:$0xff]  ;;  %v345_v29 = vld [vmem:[%s1180_s13 + $0x68] sm:$0xff]  ;;  %v358_v34 = vld [vmem:[%s1180_s13 + $0xd0] sm:$0xff] }
  0x1f   : > { %v376_v30 = vld [vmem:[%s1185_s20 + $0x60] sm:$0xff]  ;;  %v377_v32 = vld [vmem:[%s1185_s20 + $0x68] sm:$0xff]  ;;  %v359_v38 = vld [vmem:[%s1180_s13 + $0xd8] sm:$0xff] }
  0x20   : > { %v435_v31 = vpack.c.bf16 %v411_v21, %v410_v20  ;;  %v408_v33 = vmul.f32 %v376_v30, %v344_v28  ;;  %622 = vperm.xlu0 %982, %v608_v10   ;;  %933 = vmatprep.subr.msk.bf16.mxu0 %vm482_vm0, %v443_v25  ;;  %v442_v36 = vpack.c.bf16 %v425_v27, %v424_v26  ;;  %v390_v39 = vld [vmem:[%s1185_s20 + $0xd0] sm:$0xff]  ;;  %v391_v40 = vld [vmem:[%s1185_s20 + $0xd8] sm:$0xff]  ;;  %v356_v55 = vld [vmem:[%s1180_s13 + $0xc0] sm:$0xff] }
  0x21   : > { %v409_v37 = vmul.f32 %v377_v32, %v345_v29  ;;  %627 = vperm.xlu1 %983, %v609_v15   ;;  %v422_v44 = vmul.f32 %v390_v39, %v358_v34  ;;  %v423_v45 = vmul.f32 %v391_v40, %v359_v38  ;;  %v342_v46 = vld [vmem:[%s1180_s13 + $0x50] sm:$0xff]  ;;  %v343_v48 = vld [vmem:[%s1180_s13 + $0x58] sm:$0xff]  ;;  %v357_v56 = vld [vmem:[%s1180_s13 + $0xc8] sm:$0xff] }
  0x22   : > { %v511_v41 = vsel %vm482_vm0, %v435_v31, 0  ;;  %v374_v49 = vld [vmem:[%s1185_s20 + $0x50] sm:$0xff]  ;;  %v375_v50 = vld [vmem:[%s1185_s20 + $0x58] sm:$0xff]  ;;  %v388_v57 = vld [vmem:[%s1185_s20 + $0xc0] sm:$0xff] }
  0x23   : > { %914 = vmatpush3.bf16.xpose.msra.mxu0 %v511_v41  ;;  %v434_v43 = vpack.c.bf16 %v409_v37, %v408_v33  ;;  %v441_v52 = vpack.c.bf16 %v423_v45, %v422_v44  ;;  %v406_v53 = vmul.f32 %v374_v49, %v342_v46  ;;  %v407_v54 = vmul.f32 %v375_v50, %v343_v48  ;;  %v389_v58 = vld [vmem:[%s1185_s20 + $0xc8] sm:$0xff]  ;;  %v340_v62 = vld [vmem:[%s1180_s13 + $0x40] sm:$0xff]  ;;  %v354_v8 = vld [vmem:[%s1180_s13 + $0xb0] sm:$0xff] }
  0x24   : > { %934 = vmatprep.subr.msk.bf16.mxu0 %vm482_vm0, %v442_v36  ;;  %612 = vperm.xlu0 %982, %v606_v35   ;;  %v420_v60 = vmul.f32 %v388_v57, %v356_v55  ;;  %v421_v61 = vmul.f32 %v389_v58, %v357_v56  ;;  %v341_v63 = vld [vmem:[%s1180_s13 + $0x48] sm:$0xff]  ;;  %v372_v0 = vld [vmem:[%s1185_s20 + $0x40] sm:$0xff]  ;;  %v355_v9 = vld [vmem:[%s1180_s13 + $0xb8] sm:$0xff] }
  0x25   : > { %617 = vperm.xlu1 %983, %v607_v42   ;;  %v508_v51 = vsel %vm482_vm0, %v434_v43, 0  ;;  %v433_v59 = vpack.c.bf16 %v407_v54, %v406_v53  ;;  %v373_v2 = vld [vmem:[%s1185_s20 + $0x48] sm:$0xff]  ;;  %v404_v6 = vmul.f32 %v372_v0, %v340_v62  ;;  %v386_v10 = vld [vmem:[%s1185_s20 + $0xb0] sm:$0xff]  ;;  %v387_v11 = vld [vmem:[%s1185_s20 + $0xb8] sm:$0xff] }
  0x26   : > { %v440_v5 = vpack.c.bf16 %v421_v61, %v420_v60  ;;  %v405_v7 = vmul.f32 %v373_v2, %v341_v63  ;;  %v418_v13 = vmul.f32 %v386_v10, %v354_v8  ;;  %v419_v14 = vmul.f32 %v387_v11, %v355_v9  ;;  %v338_v15 = vld [vmem:[%s1180_s13 + $0x30] sm:$0xff]  ;;  %v339_v16 = vld [vmem:[%s1180_s13 + $0x38] sm:$0xff]  ;;  %v352_v23 = vld [vmem:[%s1180_s13 + $0xa0] sm:$0xff] }
  0x27   : > { %v505_v4 = vsel %vm482_vm0, %v433_v59, 0  ;;  %v370_v17 = vld [vmem:[%s1185_s20 + $0x30] sm:$0xff]  ;;  %v371_v18 = vld [vmem:[%s1185_s20 + $0x38] sm:$0xff]  ;;  %v353_v24 = vld [vmem:[%s1180_s13 + $0xa8] sm:$0xff] }
  0x28   : > { %715 = vperm.xlu0 %982, %v712_v47   ;;  %v432_v12 = vpack.c.bf16 %v405_v7, %v404_v6  ;;  %v439_v20 = vpack.c.bf16 %v419_v14, %v418_v13  ;;  %v402_v21 = vmul.f32 %v370_v17, %v338_v15  ;;  %v403_v22 = vmul.f32 %v371_v18, %v339_v16  ;;  %v384_v25 = vld [vmem:[%s1185_s20 + $0xa0] sm:$0xff]  ;;  %v385_v26 = vld [vmem:[%s1185_s20 + $0xa8] sm:$0xff]  ;;  %v350_v38 = vld [vmem:[%s1180_s13 + $0x90] sm:$0xff] }
  0x29   : > { %v416_v28 = vmul.f32 %v384_v25, %v352_v23  ;;  %v417_v29 = vmul.f32 %v385_v26, %v353_v24  ;;  %v336_v30 = vld [vmem:[%s1180_s13 + $0x20] sm:$0xff]  ;;  %v337_v31 = vld [vmem:[%s1180_s13 + $0x28] sm:$0xff]  ;;  %v351_v39 = vld [vmem:[%s1180_s13 + $0x98] sm:$0xff] }
  0x2a   : > { %v502_v19 = vsel %vm482_vm0, %v432_v12, 0  ;;  %v431_v27 = vpack.c.bf16 %v403_v22, %v402_v21  ;;  %v368_v32 = vld [vmem:[%s1185_s20 + $0x20] sm:$0xff]  ;;  %v369_v33 = vld [vmem:[%s1185_s20 + $0x28] sm:$0xff]  ;;  %v382_v40 = vld [vmem:[%s1185_s20 + $0x90] sm:$0xff] }
  0x2b   : > { %916 = vmatpush3.bf16.xpose.msra.mxu0 %v508_v51  ;;  %v438_v35 = vpack.c.bf16 %v417_v29, %v416_v28  ;;  %v400_v36 = vmul.f32 %v368_v32, %v336_v30  ;;  %v401_v37 = vmul.f32 %v369_v33, %v337_v31  ;;  %v383_v41 = vld [vmem:[%s1185_s20 + $0x98] sm:$0xff]  ;;  %v414_v43 = vmul.f32 %v382_v40, %v350_v38  ;;  %v334_v45 = vld [vmem:[%s1180_s13 + $0x10] sm:$0xff]  ;;  %v348_v53 = vld [vmem:[%s1180_s13 + $0x80] sm:$0xff] }
  0x2c   : > { %935 = vmatprep.subr.msk.bf16.mxu0 %vm482_vm0, %v441_v52  ;;  %v499_v34 = vsel %vm482_vm0, %v431_v27, 0  ;;  %v415_v44 = vmul.f32 %v383_v41, %v351_v39  ;;  %v335_v46 = vld [vmem:[%s1180_s13 + $0x18] sm:$0xff]  ;;  %v366_v47 = vld [vmem:[%s1185_s20 + $0x10] sm:$0xff]  ;;  %v349_v54 = vld [vmem:[%s1180_s13 + $0x88] sm:$0xff] }
  0x2d   : > { %v430_v42 = vpack.c.bf16 %v401_v37, %v400_v36  ;;  %v367_v48 = vld [vmem:[%s1185_s20 + $0x18] sm:$0xff]  ;;  %v398_v51 = vmul.f32 %v366_v47, %v334_v45  ;;  %v380_v55 = vld [vmem:[%s1185_s20 + $0x80] sm:$0xff]  ;;  %v381_v56 = vld [vmem:[%s1185_s20 + $0x88] sm:$0xff] }
  0x2e   : > { %v437_v50 = vpack.c.bf16 %v415_v44, %v414_v43  ;;  %v399_v52 = vmul.f32 %v367_v48, %v335_v46  ;;  %v412_v58 = vmul.f32 %v380_v55, %v348_v53  ;;  %v413_v59 = vmul.f32 %v381_v56, %v349_v54  ;;  %v332_v60 = vld [vmem:[%s1180_s13] sm:$0xff]  ;;  %v333_v61 = vld [vmem:[%s1180_s13 + $0x8] sm:$0xff]  ;;  %s996_s13 = scalar_lea.vmem %s817_s28, 32 }
  0x2f   : > { %v496_v49 = vsel %vm482_vm0, %v430_v42, 0  ;;  %v364_v62 = vld [vmem:[%s1185_s20] sm:$0xff]  ;;  %v365_v63 = vld [vmem:[%s1185_s20 + $0x8] sm:$0xff]  ;;  %p997_p11 = scmp.ne.s32.totalorder %s817_s28, %s996_s13  ;;  %s1060_s20 = smov [#allocation3]  }
  0x30   : > { %v429_v57 = vpack.c.bf16 %v399_v52, %v398_v51  ;;  %v436_v2 = vpack.c.bf16 %v413_v59, %v412_v58  ;;  %v985_v8 = vld [vmem:[%s1339_s2 + $0x8] sm:$0xff]   ;;  %v986_v40 = vld [vmem:[%s1341_s4] sm:$0xff]   ;;  %s1000_s21 = sshll.u32 %s1060_s20, 4  ;;  %s1001_s21 = int_to_ptr.vmem [resolvable:$false] %s1000_s21 }
  0x31   : > { %v987_v41 = vld [vmem:[%s1341_s4 + $0x8] sm:$0xff]   ;;  %p998_p12 = pnand %p997_p11, %p1144_p5  ;;  %s1002_s22 = scalar_lea.vmem %s1001_s21, 64 }
  0x32   : > { %v493_v0 = vsel %vm482_vm0, %v429_v57, 0  ;;  %p1003_p0 = scmp.lt.s32.totalorder %s817_s28, %s1001_s21  ;;  %p1004_p1 = scmp.lt.s32.totalorder %s1002_s22, %s996_s13 }
  0x33   : > { %918 = vmatpush3.bf16.xpose.msra.mxu0 %v505_v4  ;;  %v396_v4 = vmul.f32 %v364_v62, %v332_v60  ;;  %p999_p13 = pneg %p998_p12 }
  0x34   : > { %936 = vmatprep.subr.msk.bf16.mxu0 %vm482_vm0, %v440_v5  ;;  %v397_v5 = vmul.f32 %v365_v63, %v333_v61  ;;  %p1005_p2 = por %p1004_p1, %p1003_p0 }
  0x36   : > { %v428_v6 = vpack.c.bf16 %v397_v5, %v396_v4  ;;  %p1006_p3 = pnand %p1005_p2, %p999_p13 }
  0x38   : > { %v490_v7 = vsel %vm482_vm0, %v428_v6, 0 }
  0x3b   : > { %920 = vmatpush3.bf16.xpose.msra.mxu0 %v502_v19 }
  0x3c   : > { %937 = vmatprep.subr.msk.bf16.mxu0 %vm482_vm0, %v439_v20 }
  0x43   : > { %922 = vmatpush3.bf16.xpose.msra.mxu0 %v499_v34 }
  0x44   : > { %938 = vmatprep.subr.msk.bf16.mxu0 %vm482_vm0, %v438_v35 }
  0x4b   : > { %924 = vmatpush3.bf16.xpose.msra.mxu0 %v496_v49 }
  0x4c   : > { %939 = vmatprep.subr.msk.bf16.mxu0 %vm482_vm0, %v437_v50 }
  0x53   : > { %926 = vmatpush3.bf16.xpose.msra.mxu0 %v493_v0 }
  0x54   : > { %940 = vmatprep.subr.msk.bf16.mxu0 %vm482_vm0, %v436_v2 }
  0x5b   : > { %928 = vmatpush3.bf16.xpose.msra.mxu0 %v490_v7 }
  0x62   : > { %930 = vmatmul.mubr.msk.bf16.vlgmr.msra.gmra.mxu0 %vm482_vm0, %v1160_v1 }
  0x63   : > { %931 = vmatprep.mubr.msk.bf16.mxu0 %vm482_vm0, %v985_v8 }
  0x6a   : > { %932 = vmatmul.mubr.msk.bf16.gmra.mxu0 %vm482_vm0, %v985_v8 }
  0x93   : > { %v465_v12 = vpop.permute.xlu0 %464 }
  0x94   : > { %v455_v13 = vpop.permute.xlu1 %454 }
  0x97   : > { %v470_v17 = vpop.permute.xlu0 %469 }
  0x98   : > { %v460_v18 = vpop.permute.xlu1 %459 }
  0x9b   : > { %v623_v47 = vpop.permute.xlu0 %622 }
  0x9c   : > { %v628_v45 = vpop.permute.xlu1 %627 }
  0x9f   : > { %v613_v55 = vpop.permute.xlu0 %612 }
  0xa0   : > { %v618_v50 = vpop.permute.xlu1 %617 }
 0x122   : > { %v571_v9 = vpop.f32.mrf.mxu0 }
 0x123   : > { %v572_v31 = vadd.f32 %v571_v9, %v455_v13 }
 0x124   : > { %v573_v10 = vpop.f32.mrf.mxu0 }
 0x125   : > { %v574_v24 = vadd.f32 %v573_v10, %v455_v13  ;;  %v590_v38 = vmax.f32 %v572_v31, 0.0 }
 0x126   : > { %v575_v11 = vpop.f32.mrf.mxu0 }
 0x127   : > { %v576_v26 = vadd.f32 %v575_v11, %v460_v18  ;;  %v591_v33 = vmax.f32 %v574_v24, 0.0  ;;  %v711_v11 = vld [vmem:[%s1343_s6] sm:$0x1] }
 0x128   : > { %v577_v14 = vpop.f32.mrf.mxu0 }
 0x129   : > { %v578_v20 = vadd.f32 %v577_v14, %v460_v18  ;;  %v592_v35 = vmax.f32 %v576_v26, 0.0 }
 0x12a   : > { %v581_v15 = vpop.f32.mrf.mxu0 }
 0x12b   : > { %v582_v23 = vadd.f32 %v581_v15, %v465_v12  ;;  %v593_v28 = vmax.f32 %v578_v20, 0.0  ;;  %v598_v39 = vpack.c.bf16 %v592_v35, %v590_v38  ;;  %v716_v15 = vpop.permute.xlu0 %715 }
 0x12c   : > { %v583_v16 = vpop.f32.mrf.mxu0 }
 0x12d   : > { %v584_v21 = vadd.f32 %v583_v16, %v465_v12  ;;  %v594_v32 = vmax.f32 %v582_v23, 0.0  ;;  %v599_v37 = vpack.c.bf16 %v593_v28, %v591_v33  ;;  %v718_v12 = vlaneseq }
 0x12e   : > { %v585_v19 = vpop.f32.mrf.mxu0  ;;  %v1059_v28 = vmov 1966171168  }
 0x12f   : > { %v586_v22 = vadd.f32 %v585_v19, %v470_v17  ;;  %v595_v29 = vmax.f32 %v584_v21, 0.0  ;;  %v719_v13 = vshrl.u32 %v718_v12, 7  ;;  %vm798_vm1 = vcmp.lt.s32.totalorder %v718_v12, 256 }
 0x130   : > { %v587_v1 = vpop.f32.mrf.mxu0 }
 0x131   : > { %v588_v25 = vadd.f32 %v587_v1, %v470_v17  ;;  %v596_v27 = vmax.f32 %v586_v22, 0.0  ;;  %v720_v14 = vsub.s32 0, %v719_v13 }
 0x133   : > { %v597_v30 = vmax.f32 %v588_v25, 0.0  ;;  %v600_v36 = vpack.c.bf16 %v596_v27, %v594_v32  ;;  %v721_v16 = vrot.slane %v716_v15, %v720_v14 }
 0x135   : > { %v601_v34 = vpack.c.bf16 %v597_v30, %v595_v29  ;;  %v782_v29 = vunpack.c.l.s4 %v1059_v28 }
 0x137   : > { %658 = vmatprep.subr.bf16.mxu1 %v601_v34  ;;  %v783_v30 = vunpack.c.0.s8 %v782_v29 }
 0x138   : > { %659 = vmatpush1.bf16.msra.mxu1 %v600_v36 }
 0x139   : > { %660 = vmatprep.subr.bf16.mxu1 %v599_v37  ;;  %v786_v32 = vsub.s32 %v783_v30, %v719_v13 }
 0x13c   : > { %661 = vmatpush1.bf16.msra.mxu1 %v598_v39 }
 0x13f   : > { %902 = vmatmul.mubr.msk.bf16.vlgmr.msra.gmra.mxu1 %vm482_vm0, %v986_v40 }
 0x140   : > { %688 = vmatprep.mubr.bf16.mxu1 %v1058_v3 }
 0x147   : > { %903 = vmatmul.mubr.msk.bf16.gmra.mxu1 %vm482_vm0, %v987_v41 }
 0x148   : > { %757 = vmatprep.mubr.bf16.mxu1 %v1058_v3 }
 0x1ff   : > { %v680_v42 = vpop.f32.mrf.mxu1 }
 0x200   : > { %v681_v0 = vadd.f32 %v680_v42, %v613_v55 }
 0x201   : > { %v682_v43 = vpop.f32.mrf.mxu1 }
 0x202   : > { %v683_v58 = vadd.f32 %v682_v43, %v613_v55  ;;  %v699_v9 = vmax.f32 %v681_v0, 0.0 }
 0x203   : > { %v684_v44 = vpop.f32.mrf.mxu1 }
 0x204   : > { %v685_v60 = vadd.f32 %v684_v44, %v618_v50  ;;  %v700_v4 = vmax.f32 %v683_v58, 0.0 }
 0x205   : > { %v686_v46 = vpop.f32.mrf.mxu1 }
 0x206   : > { %v687_v52 = vadd.f32 %v686_v46, %v618_v50  ;;  %v701_v6 = vmax.f32 %v685_v60, 0.0 }
 0x207   : > { %v690_v48 = vpop.f32.mrf.mxu1 }
 0x208   : > { %v691_v56 = vadd.f32 %v690_v48, %v623_v47  ;;  %v702_v61 = vmax.f32 %v687_v52, 0.0  ;;  %v707_v10 = vpack.c.bf16 %v701_v6, %v699_v9 }
 0x209   : > { %v692_v49 = vpop.f32.mrf.mxu1 }
 0x20a   : > { %v693_v53 = vadd.f32 %v692_v49, %v623_v47  ;;  %v703_v2 = vmax.f32 %v691_v56, 0.0  ;;  %v708_v8 = vpack.c.bf16 %v702_v61, %v700_v4 }
 0x20b   : > { %v694_v51 = vpop.f32.mrf.mxu1 }
 0x20c   : > { %v695_v54 = vadd.f32 %v694_v51, %v628_v45  ;;  %v704_v62 = vmax.f32 %v693_v53, 0.0 }
 0x20d   : > { %v696_v57 = vpop.f32.mrf.mxu1 }
 0x20e   : > { %v697_v59 = vadd.f32 %v696_v57, %v628_v45  ;;  %v705_v3 = vmax.f32 %v695_v54, 0.0 }
 0x210   : > { %v706_v63 = vmax.f32 %v697_v59, 0.0  ;;  %v709_v7 = vpack.c.bf16 %v705_v3, %v703_v2 }
 0x212   : > { %v710_v5 = vpack.c.bf16 %v706_v63, %v704_v62 }
 0x214   : > { %737 = vmatprep.subr.bf16.mxu1 %v710_v5 }
 0x215   : > { %738 = vmatpush1.bf16.msra.mxu1 %v709_v7 }
 0x216   : > { %739 = vmatprep.subr.bf16.mxu1 %v708_v8 }
 0x219   : > { %740 = vmatpush1.bf16.msra.mxu1 %v707_v10 }
 0x21c   : > { %904 = vmatmul.mubr.msk.bf16.vlgmr.msra.gmra.mxu1 %vm482_vm0, %v711_v11 }
 0x2dc   : > { %v759_v17 = vpop.f32.mrf.mxu1 }
 0x2dd   : > { %v760_v18 = vadd.f32 %v759_v17, %v721_v16 }
 0x2de   : > { %v761_v19 = vpop.f32.mrf.mxu1 }
 0x2df   : > { %v905_v20 = vmul.f32 -1.442695, %v760_v18  ;;  %v762_v21 = vadd.f32 %v761_v19, %v721_v16 }
 0x2e0   : > { %v763_v22 = vpop.f32.mrf.mxu1 }
 0x2e1   : > { %988 = vpow2.f32 %v905_v20  ;;  %v906_v23 = vmul.f32 -1.442695, %v762_v21 }
 0x2e2   : > { %v764_v1 = vpop.f32.mrf.mxu1 }
 0x2e3   : > { %990 = vpow2.f32 %v906_v23 }
 0x2ee   : > { %v989_v24 = vpop.eup %988 }
 0x2ef   : > { %v772_v25 = vadd.f32 1.0, %v989_v24 }
 0x2f0   : > { %v991_v26 = vpop.eup %990 }
 0x2f1   : > { %v773_v27 = vadd.f32 1.0, %v991_v26  ;;  %992 = vrcp.f32 %v772_v25 }
 0x2f3   : > { %994 = vrcp.f32 %v773_v27 }
 0x2fe   : > { %v993_v31 = vpop.eup %992 }
 0x300   : > { %v995_v33 = vpop.eup %994 }
 0x301   : > { %v780_v34 = vcombine.low %v993_v31, %v995_v33 }
 0x303   : > { %v787_v35 = vrot.slane %v780_v34, %v786_v32 }
 0x305   : > { %v794_v36 = vrot.slane %v787_v35, %v786_v32 }
 0x307   : > { %800 = vst.msk [vmem:[%s317_s27] sm:$0x3] %vm798_vm1, %v794_v36 }
 0x308   : > { %1009 = shalt.err (!%p1006_p3)
}
 0x309   : > { %s1010_s23 = scalar_lea.hbm %s814_s14, 32  ;;  %s1014_s25 = scalar_lea.hbm %s1345_s8, 128 }
 0x30a   : > { %p1011_p4 = scmp.ne.s32.totalorder %s814_s14, %s1010_s23  ;;  %p1015_p9 = scmp.lt.s32.totalorder %s814_s14, %s1345_s8 }
 0x30b   : > { %p1016_p10 = scmp.lt.s32.totalorder %s1014_s25, %s1010_s23 }
 0x30c   : > { %p1012_p7 = pnand %p1011_p4, %p1144_p5 }
 0x30d   : > { %p1017_p11 = por %p1016_p10, %p1015_p9 }
 0x30e   : > { %p1013_p8 = pneg %p1012_p7 }
 0x310   : > { %p1018_p12 = pnand %p1017_p11, %p1013_p8 }
 0x312   : > { %1021 = shalt.err (!%p1018_p12)
}
 0x313   : > { %941 = dma.vmem_to_hbm [thread:$0]  (%p1144_p5), %s817_s28, 32, %s814_s14, %s802_s19  }
 0x314 PF: > { %p947_p13 = scmp.ge.s32.totalorder %s1056_s10, 2  ;;  %s828_s7 = sand.u32 1, %s1044_s29  }
 0x315   : > { %s829_s11 = scalar_lea.sflag [#allocation4], %s828_s7 }
 0x316   : > { %p944_p0 = pnand %p947_p13, %p1148_p6 }
 0x318   : > { %p945_p1 = pneg %p944_p0 }
 0x31a   : > { %1039 = dma.done.wait (%p945_p1), %s829_s11, 32  }
 0x31b   : > { %1041 = vsyncadd (%p945_p1), %s829_s11, 4294967264  ;;  %p20_p2 = scmp.ge.s32.totalorder %s1132_s12, 6   ;;  %s1348_s29 = smov %s1048_s30 }
 0x31c   : > { %s1349_s30 = smov %s1052_s9  ;;  %s1350_s9 = smov %s1142_s15 }
 0x31d   : > { %s1351_s10 = smov %s1132_s12  ;;  %22 = sbr.rel (!%p20_p2) target bundleno = 6 (0x6), region = 90 }
 0x322   :  { %834 = vsyncpa [#allocation4], 1 }
 0x323   :  { %836 = vsyncpa [#allocation4 + $0x1], 1 }

</bundles_post_ra>
